<compile_context>
chip_gen: v6e
topology: v6e:2x2x1
jax: 0.10.0
libtpu: 0.0.40
codegen_flags: <defaults>
</compile_context>

<pallas_src>
import functools

import jax
import jax.numpy as jnp
from jax.experimental import pallas as pl
from jax.experimental.pallas import tpu as pltpu


# Sublane granularity for batch tiles: 16 satisfies both the f32 (8) and the
# bf16 (16) packing of the output tile.
_SUBLANE = 16


def _round_up(n: int, m: int) -> int:
    return ((n + m - 1) // m) * m


def _mlp_kernel(x_ref, w1_ref, b1_ref, w2_ref, b2_ref, w3_ref, b3_ref, o_ref):
    # Cast the streamed activation tile to the matmul dtype here (no padded
    # bf16 copy of x in the wrapper).
    x = x_ref[...].astype(w1_ref.dtype)
    # Layer 1: Linear + ReLU (bf16 matmul, f32 accumulate, f32 elementwise).
    h1 = jnp.dot(x, w1_ref[...], preferred_element_type=jnp.float32)
    h1 = jnp.maximum(h1 + b1_ref[...], 0.0)
    # Layer 2: Linear + ReLU.
    h2 = jnp.dot(h1.astype(w2_ref.dtype), w2_ref[...],
                 preferred_element_type=jnp.float32)
    h2 = jnp.maximum(h2 + b2_ref[...], 0.0)
    # Layer 3: Linear (logits) -> bf16 store (lane-dense padded output block).
    logits = jnp.dot(h2.astype(w3_ref.dtype), w3_ref[...],
                     preferred_element_type=jnp.float32) + b3_ref[...]
    o_ref[...] = logits.astype(o_ref.dtype)


def prepare_params(params, compute_dtype=jnp.bfloat16):
    """One-time pad + cast of weights/biases (hoisted out of the per-call
    forward).  All matmul N dims are padded to multiples of 128 (lane-dense),
    the K dim only to a multiple of 8.  Zero padding is exact through ReLU.

    params: w1 (D,H1), b1 (1,H1), w2 (H1,H2), b2 (1,H2), w3 (H2,O), b3 (1,O)
            stored (in, out) so the kernel computes x @ W + b.
    """
    w1, b1 = params["w1"], params["b1"]
    w2, b2 = params["w2"], params["b2"]
    w3, b3 = params["w3"], params["b3"]
    D, H1 = w1.shape
    H2, O = w2.shape[1], w3.shape[1]

    D_p = _round_up(D, 8)            # K dim: sublane alignment only
    H1_p = _round_up(H1, 128)
    H2_p = _round_up(H2, 128)
    O_p = _round_up(O, 128)

    cd = compute_dtype
    f32 = jnp.float32
    return {
        "w1": jnp.zeros((D_p, H1_p), cd).at[:D, :H1].set(w1.astype(cd)),
        "b1": jnp.zeros((1, H1_p), f32).at[:, :H1].set(b1.astype(f32)),
        "w2": jnp.zeros((H1_p, H2_p), cd).at[:H1, :H2].set(w2.astype(cd)),
        "b2": jnp.zeros((1, H2_p), f32).at[:, :H2].set(b2.astype(f32)),
        "w3": jnp.zeros((H2_p, O_p), cd).at[:H2, :O].set(w3.astype(cd)),
        "b3": jnp.zeros((1, O_p), f32).at[:, :O].set(b3.astype(f32)),
    }


@functools.partial(jax.jit, static_argnames=("out_features", "block_b"))
def mnist_mlp_forward(x_nchw, prepared, *, out_features, block_b=1024):
    """Forward pass matching MyMnist_ModelV0.forward.

    x_nchw:   (B, C, H, W) float32 input images.
    prepared: output of prepare_params (pre-padded bf16 weights, f32 biases).
    returns:  (B, out_features) float32 logits.
    """
    B = x_nchw.shape[0]
    x = x_nchw.reshape(B, -1)                     # nn.Flatten(): (B, C*H*W)
    D = x.shape[1]

    w1, b1 = prepared["w1"], prepared["b1"]
    w2, b2 = prepared["w2"], prepared["b2"]
    w3, b3 = prepared["w3"], prepared["b3"]
    D_p, H1_p = w1.shape
    H2_p = w2.shape[1]
    O_p = w3.shape[1]
    if D > D_p:
        raise ValueError(f"input features {D} > prepared weight rows {D_p}")

    # Batch tiling: guard block_b to a sublane multiple, size the tile so we
    # never over-pad by (almost) a whole tile, and force >=2 tiles at large B
    # so both v7x TensorCores get work ("parallel" batch axis).
    block_b = max(_SUBLANE, (int(block_b) // _SUBLANE) * _SUBLANE)
    n_tiles = pl.cdiv(B, block_b)
    if B >= 256:
        n_tiles = max(n_tiles, 2)
    TB = _round_up(pl.cdiv(B, n_tiles), _SUBLANE)
    B_p = _round_up(B, TB)

    # Only materialize a padded copy of x when shapes actually require it; no
    # wrapper-side dtype cast (the kernel casts the streamed tile to bf16).
    if (B_p, D_p) != (B, D):
        x_in = jnp.zeros((B_p, D_p), x.dtype).at[:B, :D].set(x)
    else:
        x_in = x

    const = lambda i: (0, 0)  # weights/biases stay VMEM-resident across steps
    grid = (B_p // TB,)

    out_padded = pl.pallas_call(
        _mlp_kernel,
        # bf16 padded logits: halves output writeback vs f32.
        out_shape=jax.ShapeDtypeStruct((B_p, O_p), w1.dtype),
        grid_spec=pltpu.PrefetchScalarGridSpec(
            num_scalar_prefetch=0,
            grid=grid,
            in_specs=[
                pl.BlockSpec((TB, D_p), lambda i: (i, 0)),   # x tile (f32)
                pl.BlockSpec((D_p, H1_p), const),            # w1
                pl.BlockSpec((1, H1_p), const),              # b1
                pl.BlockSpec((H1_p, H2_p), const),           # w2
                pl.BlockSpec((1, H2_p), const),              # b2
                pl.BlockSpec((H2_p, O_p), const),            # w3
                pl.BlockSpec((1, O_p), const),                # b3
            ],
            out_specs=pl.BlockSpec((TB, O_p), lambda i: (i, 0)),
        ),
        compiler_params=pltpu.CompilerParams(
            dimension_semantics=("parallel",),  # batch tiles shard across TCs
        ),
    )(x_in, w1, b1, w2, b2, w3, b3)

    return out_padded[:B, :out_features].astype(jnp.float32)


def init_params(key, input_shape, hidden_units, hidden_units2, output_shape):
    """Deterministic init mimicking torch.nn.Linear default
    (U[-1/sqrt(fan_in), 1/sqrt(fan_in)])."""

    def linear(key, fan_in, fan_out):
        kw, kb = jax.random.split(key)
        bound = 1.0 / jnp.sqrt(jnp.float32(fan_in))
        # Stored as (in, out) so the kernel computes x @ W + b.
        w = jax.random.uniform(kw, (fan_in, fan_out), jnp.float32, -bound, bound)
        b = jax.random.uniform(kb, (1, fan_out), jnp.float32, -bound, bound)
        return w, b

    k1, k2, k3 = jax.random.split(key, 3)
    w1, b1 = linear(k1, input_shape, hidden_units)
    w2, b2 = linear(k2, hidden_units, hidden_units2)
    w3, b3 = linear(k3, hidden_units2, output_shape)
    return {"w1": w1, "b1": b1, "w2": w2, "b2": b2, "w3": w3, "b3": b3}


if __name__ == "__main__":
    key = jax.random.PRNGKey(0)
    k_x, k_p = jax.random.split(key)

    # Small MNIST-like config: 1x16x16 images -> 256 features.
    B, C, H, W = 8, 1, 16, 16
    input_shape = C * H * W      # 256
    hidden_units = 128
    hidden_units2 = 64
    output_shape = 10

    x = jax.random.normal(k_x, (B, C, H, W), dtype=jnp.float32)
    params = init_params(k_p, input_shape, hidden_units, hidden_units2,
                         output_shape)

    # One-time weight preparation (pad + bf16 cast), hoisted off the per-call
    # critical path.
    prepared = prepare_params(params)

    out = mnist_mlp_forward(x, prepared, out_features=output_shape)
    out = jax.block_until_ready(out)
    assert out.shape == (B, output_shape)
    assert out.dtype == jnp.float32

    # Cross-check against plain JAX reference doing the same bf16-fed,
    # f32-accumulated math (with the final bf16 output rounding).
    cd = jnp.bfloat16
    xf = x.reshape(B, -1)
    h1 = jnp.maximum(
        jnp.dot(xf.astype(cd), params["w1"].astype(cd),
                preferred_element_type=jnp.float32) + params["b1"], 0.0)
    h2 = jnp.maximum(
        jnp.dot(h1.astype(cd), params["w2"].astype(cd),
                preferred_element_type=jnp.float32) + params["b2"], 0.0)
    ref = (jnp.dot(h2.astype(cd), params["w3"].astype(cd),
                   preferred_element_type=jnp.float32) + params["b3"])
    ref_bf16 = ref.astype(cd).astype(jnp.float32)
    assert jnp.allclose(out, ref_bf16, atol=2e-2, rtol=2e-2), (
        f"max abs err vs bf16 ref = {jnp.max(jnp.abs(out - ref_bf16))}")

    # Also sanity-check against the exact f32 PyTorch-equivalent math
    # (loose tolerance for the bf16 casts).
    h1f = jnp.maximum(xf @ params["w1"] + params["b1"], 0.0)
    h2f = jnp.maximum(h1f @ params["w2"] + params["b2"], 0.0)
    ref_f32 = h2f @ params["w3"] + params["b3"]
    assert jnp.allclose(out, ref_f32, atol=8e-2, rtol=8e-2), (
        f"max abs err vs f32 ref = {jnp.max(jnp.abs(out - ref_f32))}")

    print("KERNEL_OK")
</pallas_src>

<mosaic_0001>
module attributes {stable_mosaic.version = 11 : i64} {
  func.func @_mlp_kernel(%arg0: i32, %arg1: memref<16x256xf32, #tpu.memory_space<vmem>>, %arg2: memref<256x128xbf16, #tpu.memory_space<vmem>>, %arg3: memref<1x128xf32, #tpu.memory_space<vmem>>, %arg4: memref<128x128xbf16, #tpu.memory_space<vmem>>, %arg5: memref<1x128xf32, #tpu.memory_space<vmem>>, %arg6: memref<128x128xbf16, #tpu.memory_space<vmem>>, %arg7: memref<1x128xf32, #tpu.memory_space<vmem>>, %arg8: memref<16x128xbf16, #tpu.memory_space<vmem>>) attributes {dimension_semantics = [#tpu.dimension_semantics<parallel>], iteration_bounds = array<i64: 1>, scalar_prefetch = 0 : i64, scratch_operands = 0 : i64, tpu.core_type = #tpu.core_type<tc>, window_params = [{transform_indices = @transform_0, window_bounds = array<i64: 16, 256>}, {pipeline_mode = #tpu.pipeline_mode<synchronous>, transform_indices = @transform_1, window_bounds = array<i64: 256, 128>}, {pipeline_mode = #tpu.pipeline_mode<synchronous>, transform_indices = @transform_2, window_bounds = array<i64: 1, 128>}, {pipeline_mode = #tpu.pipeline_mode<synchronous>, transform_indices = @transform_3, window_bounds = array<i64: 128, 128>}, {pipeline_mode = #tpu.pipeline_mode<synchronous>, transform_indices = @transform_4, window_bounds = array<i64: 1, 128>}, {pipeline_mode = #tpu.pipeline_mode<synchronous>, transform_indices = @transform_5, window_bounds = array<i64: 128, 128>}, {pipeline_mode = #tpu.pipeline_mode<synchronous>, transform_indices = @transform_6, window_bounds = array<i64: 1, 128>}, {transform_indices = @transform_7, window_bounds = array<i64: 16, 128>}]} {
    %c0 = arith.constant 0 : index
    %c0_0 = arith.constant 0 : index
    %0 = vector.load %arg1[%c0, %c0_0] : memref<16x256xf32, #tpu.memory_space<vmem>>, vector<16x256xf32>
    %1 = arith.truncf %0 : vector<16x256xf32> to vector<16x256xbf16>
    %c0_1 = arith.constant 0 : index
    %c0_2 = arith.constant 0 : index
    %2 = vector.load %arg2[%c0_1, %c0_2] : memref<256x128xbf16, #tpu.memory_space<vmem>>, vector<256x128xbf16>
    %cst = arith.constant dense<0.000000e+00> : vector<16x128xf32>
    %3 = tpu.matmul %1, %2, %cst {dimension_numbers = #tpu.dot_dimension_numbers<[1], [0], [0], [1], [0, 0, 1, 1], [], []>} : vector<16x256xbf16>, vector<256x128xbf16>, vector<16x128xf32> -> vector<16x128xf32>
    %c0_3 = arith.constant 0 : index
    %c0_4 = arith.constant 0 : index
    %4 = vector.load %arg3[%c0_3, %c0_4] : memref<1x128xf32, #tpu.memory_space<vmem>>, vector<1x128xf32>
    %5 = vector.broadcast %4 : vector<1x128xf32> to vector<16x128xf32>
    %6 = arith.addf %3, %5 : vector<16x128xf32>
    %cst_5 = arith.constant 0.000000e+00 : f32
    %7 = vector.broadcast %cst_5 : f32 to vector<16x128xf32>
    %8 = arith.maximumf %6, %7 : vector<16x128xf32>
    %9 = arith.truncf %8 : vector<16x128xf32> to vector<16x128xbf16>
    %c0_6 = arith.constant 0 : index
    %c0_7 = arith.constant 0 : index
    %10 = vector.load %arg4[%c0_6, %c0_7] : memref<128x128xbf16, #tpu.memory_space<vmem>>, vector<128x128xbf16>
    %cst_8 = arith.constant dense<0.000000e+00> : vector<16x128xf32>
    %11 = tpu.matmul %9, %10, %cst_8 {dimension_numbers = #tpu.dot_dimension_numbers<[1], [0], [0], [1], [0, 0, 1, 1], [], []>} : vector<16x128xbf16>, vector<128x128xbf16>, vector<16x128xf32> -> vector<16x128xf32>
    %c0_9 = arith.constant 0 : index
    %c0_10 = arith.constant 0 : index
    %12 = vector.load %arg5[%c0_9, %c0_10] : memref<1x128xf32, #tpu.memory_space<vmem>>, vector<1x128xf32>
    %13 = vector.broadcast %12 : vector<1x128xf32> to vector<16x128xf32>
    %14 = arith.addf %11, %13 : vector<16x128xf32>
    %cst_11 = arith.constant 0.000000e+00 : f32
    %15 = vector.broadcast %cst_11 : f32 to vector<16x128xf32>
    %16 = arith.maximumf %14, %15 : vector<16x128xf32>
    %17 = arith.truncf %16 : vector<16x128xf32> to vector<16x128xbf16>
    %c0_12 = arith.constant 0 : index
    %c0_13 = arith.constant 0 : index
    %18 = vector.load %arg6[%c0_12, %c0_13] : memref<128x128xbf16, #tpu.memory_space<vmem>>, vector<128x128xbf16>
    %cst_14 = arith.constant dense<0.000000e+00> : vector<16x128xf32>
    %19 = tpu.matmul %17, %18, %cst_14 {dimension_numbers = #tpu.dot_dimension_numbers<[1], [0], [0], [1], [0, 0, 1, 1], [], []>} : vector<16x128xbf16>, vector<128x128xbf16>, vector<16x128xf32> -> vector<16x128xf32>
    %c0_15 = arith.constant 0 : index
    %c0_16 = arith.constant 0 : index
    %20 = vector.load %arg7[%c0_15, %c0_16] : memref<1x128xf32, #tpu.memory_space<vmem>>, vector<1x128xf32>
    %21 = vector.broadcast %20 : vector<1x128xf32> to vector<16x128xf32>
    %22 = arith.addf %19, %21 : vector<16x128xf32>
    %23 = arith.truncf %22 : vector<16x128xf32> to vector<16x128xbf16>
    %c0_17 = arith.constant 0 : index
    %c0_18 = arith.constant 0 : index
    %24 = vector.load %arg8[%c0_17, %c0_18] : memref<16x128xbf16, #tpu.memory_space<vmem>>, vector<16x128xbf16>
    tpu.vector_store %arg8[%c0_17, %c0_18], %23 {strides = array<i32>} : memref<16x128xbf16, #tpu.memory_space<vmem>>, vector<16x128xbf16>,
    return
  }
  func.func @transform_0(%arg0: i32) -> (i32, i32) {
    %c0_i32 = arith.constant 0 : i32
    %c0_i32_0 = arith.constant 0 : i32
    return %arg0, %c0_i32 : i32, i32
  }
  func.func @transform_1(%arg0: i32) -> (i32, i32) {
    %c0_i32 = arith.constant 0 : i32
    %c0_i32_0 = arith.constant 0 : i32
    %c0_i32_1 = arith.constant 0 : i32
    return %c0_i32, %c0_i32_0 : i32, i32
  }
  func.func @transform_2(%arg0: i32) -> (i32, i32) {
    %c0_i32 = arith.constant 0 : i32
    %c0_i32_0 = arith.constant 0 : i32
    %c0_i32_1 = arith.constant 0 : i32
    return %c0_i32, %c0_i32_0 : i32, i32
  }
  func.func @transform_3(%arg0: i32) -> (i32, i32) {
    %c0_i32 = arith.constant 0 : i32
    %c0_i32_0 = arith.constant 0 : i32
    %c0_i32_1 = arith.constant 0 : i32
    return %c0_i32, %c0_i32_0 : i32, i32
  }
  func.func @transform_4(%arg0: i32) -> (i32, i32) {
    %c0_i32 = arith.constant 0 : i32
    %c0_i32_0 = arith.constant 0 : i32
    %c0_i32_1 = arith.constant 0 : i32
    return %c0_i32, %c0_i32_0 : i32, i32
  }
  func.func @transform_5(%arg0: i32) -> (i32, i32) {
    %c0_i32 = arith.constant 0 : i32
    %c0_i32_0 = arith.constant 0 : i32
    %c0_i32_1 = arith.constant 0 : i32
    return %c0_i32, %c0_i32_0 : i32, i32
  }
  func.func @transform_6(%arg0: i32) -> (i32, i32) {
    %c0_i32 = arith.constant 0 : i32
    %c0_i32_0 = arith.constant 0 : i32
    %c0_i32_1 = arith.constant 0 : i32
    return %c0_i32, %c0_i32_0 : i32, i32
  }
  func.func @transform_7(%arg0: i32) -> (i32, i32) {
    %c0_i32 = arith.constant 0 : i32
    %c0_i32_0 = arith.constant 0 : i32
    return %arg0, %c0_i32 : i32, i32
  }
}

</mosaic_0001>

<bundles_post_ra>
// kernel: mnist_mlp_forward.1
= control target key start
LH: loop header
LB: loop body
LE: loop exit
PB: predicated region body
PF: predicated region fallthrough
CT: control target
= control target key end

     0   :  { %12 = vsyncpa [#allocation3], 0  ;;  %s651_s24 = smov [#allocation2]   ;;  %s813_s0 = inlined_call_operand.vmem [shape: f32[16,256], index: 0, kind: input, shape index: {}]   ;;  %s814_s1 = inlined_call_operand.vmem [shape: bf16[256,128], index: 1, kind: input, shape index: {}]   ;;  %s815_s2 = inlined_call_operand.vmem [shape: f32[1,128], index: 2, kind: input, shape index: {}]   ;;  %s816_s3 = inlined_call_operand.vmem [shape: bf16[128,128], index: 3, kind: input, shape index: {}]   ;;  %s817_s4 = inlined_call_operand.vmem [shape: f32[1,128], index: 4, kind: input, shape index: {}]   ;;  %s818_s5 = inlined_call_operand.hbm [shape: bf16[128,128], index: 5, kind: input, shape index: {}]   ;;  %s819_s6 = inlined_call_operand.vmem [shape: f32[1,128], index: 6, kind: input, shape index: {}]   ;;  %s820_s7 = inlined_call_operand.vmem [shape: bf16[16,128], index: 7, kind: output, shape index: {}]  }
   0x1   :  { %s28_s25 = sshll.u32 %s651_s24, 4  ;;  %s29_s25 = int_to_ptr.vmem [resolvable:$true] %s28_s25 }
   0x2   :  { %s637_s26 = scalar_lea.vmem %s29_s25, 1024  ;;  %p642_p1 = scmp.lt.s32.totalorder %s29_s25, %s29_s25 }
   0x3   :  { %p638_p0 = scmp.ne.s32.totalorder %s29_s25, %s637_s26  ;;  %p643_p2 = scmp.lt.s32.totalorder %s637_s26, %s637_s26 }
   0x5   :  { %p644_p3 = por %p643_p2, %p642_p1 }
   0x7   :  { %p645_p4 = pnand %p644_p3, %p638_p0 }
   0x9   :  { %648 = shalt.err (!%p645_p4)
}
   0xa   :  { %s652_s27 = smov 64   ;;  %s653_s28 = smov 4  }
   0xb   :  { %34 = dma.hbm_to_vmem [thread:$0]  %s818_s5, 1024, %s29_s25, [#allocation3], %s652_s27, %s652_s27, %s653_s28  }
   0xc   :  { %649 = dma.done.wait [#allocation3], 1024  }
   0xd   :  { %650 = vsyncadd [#allocation3], 4294966272  ;;  %v654_v0 = vmov 0.0   ;;  %v597_v1 = vld [vmem:[%s814_s1 + $0x78] sm:$0xff]   ;;  %v599_v3 = vld [vmem:[%s814_s1 + $0x70] sm:$0xff]   ;;  %vm655_vm0 = vmmov 0  }
   0xe   :  { %552 = vmatprep.subr.bf16.mxu1 %v654_v0  ;;  %v598_v2 = vld [vmem:[%s814_s1 + $0x38] sm:$0xff]   ;;  %512 = vmatprep.subr.bf16.mxu0 %v597_v1  ;;  %v600_v4 = vld [vmem:[%s814_s1 + $0x30] sm:$0xff]   ;;  %v601_v5 = vld [vmem:[%s814_s1 + $0x68] sm:$0xff]  }
   0xf   :  { %513 = vmatpush3.bf16.msra.mxu0 %v598_v2  ;;  %v602_v6 = vld [vmem:[%s814_s1 + $0x28] sm:$0xff]   ;;  %v603_v7 = vld [vmem:[%s814_s1 + $0x60] sm:$0xff]   ;;  %v605_v9 = vld [vmem:[%s814_s1 + $0x58] sm:$0xff]   ;;  %568 = vmatprep.mubr.msk.bf16.mxu1 %vm655_vm0, %v654_v0 }
  0x10   :  { %514 = vmatprep.subr.bf16.mxu0 %v599_v3  ;;  %v604_v8 = vld [vmem:[%s814_s1 + $0x20] sm:$0xff]   ;;  %v606_v10 = vld [vmem:[%s814_s1 + $0x18] sm:$0xff]   ;;  %v607_v11 = vld [vmem:[%s814_s1 + $0x50] sm:$0xff]  }
  0x11   :  { %v42_v12 = vld [vmem:[%s813_s0 + $0x8] sm:$0xff]  ;;  %v44_v13 = vld [vmem:[%s813_s0 + $0x18] sm:$0xff]  ;;  %v608_v14 = vld [vmem:[%s814_s1 + $0x10] sm:$0xff]  }
  0x12   :  { %v46_v15 = vpack.c.bf16 %v44_v13, %v42_v12  ;;  %v613_v16 = vld [vmem:[%s816_s3 + $0x38] sm:$0xff]   ;;  %v609_v17 = vld [vmem:[%s814_s1 + $0x48] sm:$0xff]   ;;  %v614_v18 = vld [vmem:[%s816_s3 + $0x30] sm:$0xff]  }
  0x13   :  { %515 = vmatpush3.bf16.msra.mxu0 %v600_v4  ;;  %553 = vmatpush3.bf16.msra.mxu1 %v613_v16  ;;  %v610_v19 = vld [vmem:[%s814_s1 + $0x8] sm:$0xff]   ;;  %v611_v20 = vld [vmem:[%s814_s1 + $0x40] sm:$0xff]   ;;  %v43_v24 = vld [vmem:[%s813_s0 + $0x10] sm:$0xff] }
  0x14   :  { %516 = vmatprep.subr.bf16.mxu0 %v601_v5  ;;  %214 = vmatprep.mubr.bf16.mxu0 %v46_v15  ;;  %v615_v21 = vld [vmem:[%s816_s3 + $0x28] sm:$0xff]   ;;  %v612_v22 = vld [vmem:[%s814_s1] sm:$0xff]   ;;  %v617_v27 = vld [vmem:[%s816_s3 + $0x18] sm:$0xff]  }
  0x15   :  { %554 = vmatprep.subr.bf16.mxu1 %v654_v0  ;;  %v41_v23 = vld [vmem:[%s813_s0] sm:$0xff]  ;;  %v618_v28 = vld [vmem:[%s816_s3 + $0x10] sm:$0xff]   ;;  %v619_v29 = vld [vmem:[%s816_s3 + $0x8] sm:$0xff]  }
  0x16   :  { %v616_v25 = vld [vmem:[%s816_s3 + $0x20] sm:$0xff]   ;;  %v45_v26 = vpack.c.bf16 %v43_v24, %v41_v23  ;;  %v621_v31 = vld [vmem:[#allocation2 + $0x38] sm:$0xff]   ;;  %v622_v32 = vld [vmem:[#allocation2 + $0x30] sm:$0xff]  }
  0x17   :  { %517 = vmatpush3.bf16.msra.mxu0 %v602_v6  ;;  %555 = vmatpush3.bf16.msra.mxu1 %v614_v18  ;;  %v620_v30 = vld [vmem:[%s816_s3] sm:$0xff]   ;;  %v623_v33 = vld [vmem:[#allocation2 + $0x28] sm:$0xff]   ;;  %v625_v35 = vld [vmem:[#allocation2 + $0x18] sm:$0xff]  }
  0x18   :  { %518 = vmatprep.subr.bf16.mxu0 %v603_v7  ;;  %556 = vmatprep.subr.bf16.mxu1 %v654_v0  ;;  %v624_v34 = vld [vmem:[#allocation2 + $0x20] sm:$0xff]   ;;  %v626_v48 = vld [vmem:[#allocation2 + $0x10] sm:$0xff]   ;;  %v627_v49 = vld [vmem:[#allocation2 + $0x8] sm:$0xff]  }
  0x19   :  { %v468_v39 = vld [vmem:[%s815_s2] ss:$0 sm:$0xff] }
  0x1a   :  { %v628_v50 = vld [vmem:[#allocation2] sm:$0xff]  }
  0x1b   :  { %519 = vmatpush3.bf16.msra.mxu0 %v604_v8  ;;  %557 = vmatpush3.bf16.msra.mxu1 %v615_v21  ;;  %v485_v51 = vld [vmem:[%s817_s4] ss:$0 sm:$0xff] }
  0x1c   :  { %520 = vmatprep.subr.bf16.mxu0 %v605_v9  ;;  %558 = vmatprep.subr.bf16.mxu1 %v654_v0  ;;  %v494_v62 = vld [vmem:[%s819_s6] ss:$0 sm:$0xff] }
  0x1f   :  { %521 = vmatpush3.bf16.msra.mxu0 %v606_v10  ;;  %559 = vmatpush3.bf16.msra.mxu1 %v616_v25 }
  0x20   :  { %522 = vmatprep.subr.bf16.mxu0 %v607_v11  ;;  %560 = vmatprep.subr.bf16.mxu1 %v654_v0 }
  0x23   :  { %523 = vmatpush3.bf16.msra.mxu0 %v608_v14  ;;  %561 = vmatpush3.bf16.msra.mxu1 %v617_v27 }
  0x24   :  { %524 = vmatprep.subr.bf16.mxu0 %v609_v17  ;;  %562 = vmatprep.subr.bf16.mxu1 %v654_v0 }
  0x27   :  { %525 = vmatpush3.bf16.msra.mxu0 %v610_v19  ;;  %563 = vmatpush3.bf16.msra.mxu1 %v618_v28 }
  0x28   :  { %526 = vmatprep.subr.bf16.mxu0 %v611_v20  ;;  %564 = vmatprep.subr.bf16.mxu1 %v654_v0 }
  0x2b   :  { %527 = vmatpush3.bf16.msra.mxu0 %v612_v22  ;;  %565 = vmatpush3.bf16.msra.mxu1 %v619_v29 }
  0x2c   :  { %572 = vmatprep.subr.bf16.mxu0 %v654_v0  ;;  %566 = vmatprep.subr.bf16.mxu1 %v654_v0 }
  0x2e   :  { %215 = vmatmul.mubr.bf16.vlgmr.msra.gmra.mxu0 %v45_v26 }
  0x2f   :  { %567 = vmatpush3.bf16.msra.mxu1 %v620_v30  ;;  %588 = vmatprep.mubr.msk.bf16.mxu0 %vm655_vm0, %v654_v0 }
  0x30   :  { %573 = vmatpush3.bf16.msra.mxu0 %v621_v31 }
  0x31   :  { %574 = vmatprep.subr.bf16.mxu0 %v654_v0 }
  0x34   :  { %575 = vmatpush3.bf16.msra.mxu0 %v622_v32 }
  0x35   :  { %576 = vmatprep.subr.bf16.mxu0 %v654_v0 }
  0x38   :  { %577 = vmatpush3.bf16.msra.mxu0 %v623_v33 }
  0x39   :  { %578 = vmatprep.subr.bf16.mxu0 %v654_v0 }
  0x3c   :  { %579 = vmatpush3.bf16.msra.mxu0 %v624_v34 }
  0x3d   :  { %580 = vmatprep.subr.bf16.mxu0 %v654_v0 }
  0x40   :  { %581 = vmatpush3.bf16.msra.mxu0 %v625_v35 }
  0x41   :  { %582 = vmatprep.subr.bf16.mxu0 %v654_v0 }
  0x44   :  { %583 = vmatpush3.bf16.msra.mxu0 %v626_v48 }
  0x45   :  { %584 = vmatprep.subr.bf16.mxu0 %v654_v0 }
  0x48   :  { %585 = vmatpush3.bf16.msra.mxu0 %v627_v49 }
  0x49   :  { %586 = vmatprep.subr.bf16.mxu0 %v654_v0 }
  0x4c   :  { %587 = vmatpush3.bf16.msra.mxu0 %v628_v50 }
  0xee   :  { %v528_v36 = vpop.f32.mrf.mxu0 }
  0xf0   :  { %v529_v37 = vpop.f32.mrf.mxu0 }
  0xf1   :  { %v530_v38 = vadd.f32 %v529_v37, %v528_v36 }
  0xf2   :  { %v531_v40 = vpop.f32.mrf.mxu0 }
  0xf3   :  { %v217_v42 = vadd.f32 %v530_v38, %v468_v39 }
  0xf4   :  { %v532_v41 = vpop.f32.mrf.mxu0 }
  0xf5   :  { %v533_v43 = vadd.f32 %v532_v41, %v531_v40  ;;  %v223_v45 = vmax.f32 %v217_v42, 0.0 }
  0xf7   :  { %v220_v44 = vadd.f32 %v533_v43, %v468_v39 }
  0xf9   :  { %v224_v46 = vmax.f32 %v220_v44, 0.0 }
  0xfb   :  { %v225_v47 = vpack.c.bf16 %v224_v46, %v223_v45 }
  0xfd   :  { %569 = vmatmul.mubr.bf16.vlgmr.msra.gmra.mxu1 %v225_v47 }
 0x1bd   :  { %v331_v52 = vpop.f32.mrf.mxu1 }
 0x1be   :  { %v332_v54 = vadd.f32 %v485_v51, %v331_v52 }
 0x1bf   :  { %v570_v53 = vpop.f32.mrf.mxu1 }
 0x1c0   :  { %v338_v58 = vmax.f32 %v332_v54, 0.0 }
 0x1c1   :  { %v334_v55 = vpop.f32.mrf.mxu1 }
 0x1c2   :  { %v335_v56 = vadd.f32 %v485_v51, %v334_v55 }
 0x1c3   :  { %v571_v57 = vpop.f32.mrf.mxu1 }
 0x1c4   :  { %v339_v59 = vmax.f32 %v335_v56, 0.0 }
 0x1c6   :  { %v340_v60 = vpack.c.bf16 %v339_v59, %v338_v58 }
 0x1c8   :  { %589 = vmatmul.mubr.bf16.vlgmr.msra.gmra.mxu0 %v340_v60 }
 0x288   :  { %v446_v61 = vpop.f32.mrf.mxu0 }
 0x289   :  { %v447_v1 = vadd.f32 %v494_v62, %v446_v61 }
 0x28a   :  { %v590_v63 = vpop.f32.mrf.mxu0 }
 0x28c   :  { %v449_v0 = vpop.f32.mrf.mxu0 }
 0x28d   :  { %v450_v2 = vadd.f32 %v494_v62, %v449_v0 }
 0x28e   :  { %v591_v3 = vpop.f32.mrf.mxu0 }
 0x28f   :  { %v510_v4 = vpack.c.bf16 %v450_v2, %v447_v1 }
 0x291   :  { %511 = vst [vmem:[%s820_s7] sm:$0xff] %v510_v4  }
 0x292   :  { %467 = vsyncpa [#allocation3], 1 }

</bundles_post_ra>
